<compile_context>
chip_gen: v7x
topology: tpu7x:2x2x1
jax: 0.10.0
libtpu: 0.0.40
codegen_flags: <defaults>
</compile_context>

<pallas_src>
import functools
import math

import jax
import jax.numpy as jnp
from jax import lax
from jax.experimental import pallas as pl
from jax.experimental.pallas import tpu as pltpu


def _layernorm_nd_kernel(x_ref, w_ref, b_ref, o_ref, *, eps, inv_c):
    # x_ref: (1, C, TS) block — channels on sublanes, spatial on lanes.
    x = x_ref[...].astype(jnp.float32)

    # Two-pass statistics over the channel (sublane) axis.  The tile is
    # already resident so the second pass is nearly free, and it avoids the
    # E[x^2] - mean^2 cancellation that can make rsqrt produce NaN.
    u = jnp.sum(x, axis=1, keepdims=True) * inv_c          # (1, 1, TS) mean
    xc = x - u                                             # centered
    var = jnp.sum(xc * xc, axis=1, keepdims=True) * inv_c  # biased variance
    inv_std = lax.rsqrt(var + eps)                         # EUP rsqrt, per-lane

    w = w_ref[...].astype(jnp.float32)                     # (1, C, 1)
    b = b_ref[...].astype(jnp.float32)                     # (1, C, 1)

    # out = (x - u) * inv_std * w + b : no block-sized scale/shift temporaries.
    o_ref[...] = ((xc * inv_std) * w + b).astype(o_ref.dtype)


def _pick_tile_s(n, s, c, dtype_bytes, max_block_bytes, vmem_limit_bytes):
    """Lane-tile (multiple of 128) sized from the HBM-block target and the
    dtype-aware VMEM working-set budget; no divisor-of-S constraint."""
    s_units = pl.cdiv(s, 128)                 # 128-lane units to cover S

    # HBM block-size target: amortize the ~0.35 us per-grid-step overhead.
    hbm_budget = max(1, max_block_bytes // (c * 128 * dtype_bytes))

    # VMEM working set per 128-lane unit:
    #   2x double-buffered input blocks + 2x output blocks (native dtype)
    #   + ~3 f32 block-sized temporaries inside the kernel (x, xc, result).
    vmem_per_unit = c * 128 * (4 * dtype_bytes + 3 * 4)
    vmem_budget = max(1, int(0.75 * vmem_limit_bytes) // vmem_per_unit)

    units = max(1, min(s_units, hbm_budget, vmem_budget))

    # v7x has 2 TensorCores sharing the parallel grid: keep at least ~4 grid
    # steps when the shape allows so neither core sits idle.
    while units > 1 and n * pl.cdiv(s_units, units) < 4:
        units = pl.cdiv(units, 2)
    return units * 128


def layernorm_nd(x, weight, bias, *, eps=1e-6,
                 max_block_bytes=None, vmem_limit_bytes=None):
    """LayerNormNd forward. x is NCHW / NCDHW: (N, C, *spatial); reduce over dim 1."""
    n, c = x.shape[0], x.shape[1]
    spatial = x.shape[2:]
    s = math.prod(spatial) if spatial else 1
    dtype_bytes = jnp.dtype(x.dtype).itemsize

    # Free reshape (no transpose, no extra HBM pass): (N, C, *spatial) -> (N, C, S).
    x3d = x.reshape(n, c, s)

    # Generation-aware budgets: big VMEM (v5e/v6e, 128 MiB) -> larger blocks;
    # v7x (64 MiB physical / 32 MiB scoped) -> 4 MiB blocks, 32 MiB limit.
    if max_block_bytes is None or vmem_limit_bytes is None:
        try:
            vmem_cap = pltpu.get_tpu_info().vmem_capacity_bytes
        except Exception:
            vmem_cap = 64 * 1024 * 1024
        if vmem_cap >= 96 * 1024 * 1024:          # v5e / v6e
            mbb, vlb = 8 * 1024 * 1024, 64 * 1024 * 1024
        else:                                      # v7x or unknown
            mbb, vlb = 4 * 1024 * 1024, 32 * 1024 * 1024
        max_block_bytes = mbb if max_block_bytes is None else max_block_bytes
        vmem_limit_bytes = vlb if vmem_limit_bytes is None else vmem_limit_bytes

    tile_s = _pick_tile_s(n, s, c, dtype_bytes, max_block_bytes, vmem_limit_bytes)
    grid = (n, pl.cdiv(s, tile_s))               # ragged last block is masked

    w3d = weight.reshape(1, c, 1)
    b3d = bias.reshape(1, c, 1)

    kernel = functools.partial(_layernorm_nd_kernel, eps=eps, inv_c=1.0 / c)
    out3d = pl.pallas_call(
        kernel,
        out_shape=jax.ShapeDtypeStruct((n, c, s), x.dtype),
        grid_spec=pltpu.PrefetchScalarGridSpec(
            num_scalar_prefetch=0,
            grid=grid,
            in_specs=[
                # Lane-dense activation tile; boundary lanes (if S % tile_s)
                # are masked by Pallas on the output write.
                pl.BlockSpec((1, c, tile_s), lambda i, j: (i, 0, j)),
                # Params: constant block index -> fetched once, stay resident.
                pl.BlockSpec((1, c, 1), lambda i, j: (0, 0, 0)),
                pl.BlockSpec((1, c, 1), lambda i, j: (0, 0, 0)),
            ],
            out_specs=pl.BlockSpec((1, c, tile_s), lambda i, j: (i, 0, j)),
        ),
        compiler_params=pltpu.CompilerParams(
            dimension_semantics=("parallel", "parallel"),
            vmem_limit_bytes=vmem_limit_bytes,
        ),
        cost_estimate=pl.CostEstimate(
            flops=8 * n * c * s,
            transcendentals=n * s,
            bytes_accessed=2 * n * c * s * dtype_bytes,
        ),
    )(x3d, w3d, b3d)

    return out3d.reshape(x.shape)


def _reference(x, weight, bias, eps=1e-6):
    # Pure-JAX mirror of the PyTorch forward (NCHW, reduce over dim 1).
    u = jnp.mean(x, axis=1, keepdims=True)
    s = jnp.mean((x - u) ** 2, axis=1, keepdims=True)
    xn = (x - u) / jnp.sqrt(s + eps)
    shape = (1, x.shape[1]) + (1,) * (x.ndim - 2)
    return weight.reshape(shape) * xn + bias.reshape(shape)


if __name__ == "__main__":
    key = jax.random.PRNGKey(0)
    n, c, h, w = 2, 4, 16, 16
    x = jax.random.normal(key, (n, c, h, w), dtype=jnp.float32)

    # Deterministic parameter init, matching nn.Parameter(torch.ones/zeros(C)).
    weight = jnp.ones((c,), dtype=jnp.float32)
    bias = jnp.zeros((c,), dtype=jnp.float32)

    out = layernorm_nd(x, weight, bias, eps=1e-6)
    out = jax.block_until_ready(out)

    ref = _reference(x, weight, bias, eps=1e-6)
    assert out.shape == (n, c, h, w)
    assert jnp.allclose(out, ref, atol=1e-4, rtol=1e-4)

    # Also exercise the ragged (non-128-aligned S) path that replaced jnp.pad.
    key2 = jax.random.PRNGKey(1)
    x2 = jax.random.normal(key2, (2, 4, 7, 9), dtype=jnp.float32)
    out2 = jax.block_until_ready(layernorm_nd(x2, weight, bias, eps=1e-6))
    ref2 = _reference(x2, weight, bias, eps=1e-6)
    assert out2.shape == x2.shape
    assert jnp.allclose(out2, ref2, atol=1e-4, rtol=1e-4)

    print("KERNEL_OK")
</pallas_src>

<mosaic_0001>
module attributes {stable_mosaic.version = 11 : i64} {
  func.func @_layernorm_nd_kernel(%arg0: i32, %arg1: i32, %arg2: memref<1x4x128xf32, #tpu.memory_space<vmem>>, %arg3: memref<1x4x1xf32, #tpu.memory_space<vmem>>, %arg4: memref<1x4x1xf32, #tpu.memory_space<vmem>>, %arg5: memref<1x4x128xf32, #tpu.memory_space<vmem>>) attributes {dimension_semantics = [#tpu.dimension_semantics<parallel>, #tpu.dimension_semantics<parallel>], iteration_bounds = array<i64: 2, 2>, scalar_prefetch = 0 : i64, scratch_operands = 0 : i64, tpu.core_type = #tpu.core_type<tc>, window_params = [{transform_indices = @transform_0, window_bounds = array<i64: 1, 4, 128>}, {pipeline_mode = #tpu.pipeline_mode<synchronous>, transform_indices = @transform_1, window_bounds = array<i64: 1, 4, 1>}, {pipeline_mode = #tpu.pipeline_mode<synchronous>, transform_indices = @transform_2, window_bounds = array<i64: 1, 4, 1>}, {transform_indices = @transform_3, window_bounds = array<i64: 1, 4, 128>}]} {
    %c0 = arith.constant 0 : index
    %c0_0 = arith.constant 0 : index
    %c0_1 = arith.constant 0 : index
    %0 = vector.load %arg2[%c0, %c0_0, %c0_1] : memref<1x4x128xf32, #tpu.memory_space<vmem>>, vector<1x4x128xf32>
    %cst = arith.constant dense<0.000000e+00> : vector<1x128xf32>
    %1 = vector.multi_reduction <add>, %0, %cst [1] : vector<1x4x128xf32> to vector<1x128xf32>
    %2 = vector.shape_cast %1 : vector<1x128xf32> to vector<1x1x128xf32>
    %cst_2 = arith.constant 2.500000e-01 : f32
    %3 = vector.broadcast %cst_2 : f32 to vector<1x1x128xf32>
    %4 = arith.mulf %2, %3 : vector<1x1x128xf32>
    %5 = vector.broadcast %4 : vector<1x1x128xf32> to vector<1x4x128xf32>
    %6 = arith.subf %0, %5 : vector<1x4x128xf32>
    %7 = arith.mulf %6, %6 : vector<1x4x128xf32>
    %cst_3 = arith.constant dense<0.000000e+00> : vector<1x128xf32>
    %8 = vector.multi_reduction <add>, %7, %cst_3 [1] : vector<1x4x128xf32> to vector<1x128xf32>
    %9 = vector.shape_cast %8 : vector<1x128xf32> to vector<1x1x128xf32>
    %cst_4 = arith.constant 2.500000e-01 : f32
    %10 = vector.broadcast %cst_4 : f32 to vector<1x1x128xf32>
    %11 = arith.mulf %9, %10 : vector<1x1x128xf32>
    %cst_5 = arith.constant 9.99999997E-7 : f32
    %12 = vector.broadcast %cst_5 : f32 to vector<1x1x128xf32>
    %13 = arith.addf %11, %12 : vector<1x1x128xf32>
    %14 = math.rsqrt %13 : vector<1x1x128xf32>
    %c0_6 = arith.constant 0 : index
    %c0_7 = arith.constant 0 : index
    %c0_8 = arith.constant 0 : index
    %15 = vector.load %arg3[%c0_6, %c0_7, %c0_8] : memref<1x4x1xf32, #tpu.memory_space<vmem>>, vector<1x4x1xf32>
    %c0_9 = arith.constant 0 : index
    %c0_10 = arith.constant 0 : index
    %c0_11 = arith.constant 0 : index
    %16 = vector.load %arg4[%c0_9, %c0_10, %c0_11] : memref<1x4x1xf32, #tpu.memory_space<vmem>>, vector<1x4x1xf32>
    %17 = vector.broadcast %14 : vector<1x1x128xf32> to vector<1x4x128xf32>
    %18 = arith.mulf %6, %17 : vector<1x4x128xf32>
    %19 = vector.broadcast %15 : vector<1x4x1xf32> to vector<1x4x128xf32>
    %20 = arith.mulf %18, %19 : vector<1x4x128xf32>
    %21 = vector.broadcast %16 : vector<1x4x1xf32> to vector<1x4x128xf32>
    %22 = arith.addf %20, %21 : vector<1x4x128xf32>
    %c0_12 = arith.constant 0 : index
    %c0_13 = arith.constant 0 : index
    %c0_14 = arith.constant 0 : index
    %23 = vector.load %arg5[%c0_12, %c0_13, %c0_14] : memref<1x4x128xf32, #tpu.memory_space<vmem>>, vector<1x4x128xf32>
    tpu.vector_store %arg5[%c0_12, %c0_13, %c0_14], %22 {strides = array<i32>} : memref<1x4x128xf32, #tpu.memory_space<vmem>>, vector<1x4x128xf32>,
    return
  }
  func.func @transform_0(%arg0: i32, %arg1: i32) -> (i32, i32, i32) {
    %c0_i32 = arith.constant 0 : i32
    %c0_i32_0 = arith.constant 0 : i32
    return %arg0, %c0_i32, %arg1 : i32, i32, i32
  }
  func.func @transform_1(%arg0: i32, %arg1: i32) -> (i32, i32, i32) {
    %c0_i32 = arith.constant 0 : i32
    %c0_i32_0 = arith.constant 0 : i32
    %c0_i32_1 = arith.constant 0 : i32
    %c0_i32_2 = arith.constant 0 : i32
    return %c0_i32, %c0_i32_0, %c0_i32_1 : i32, i32, i32
  }
  func.func @transform_2(%arg0: i32, %arg1: i32) -> (i32, i32, i32) {
    %c0_i32 = arith.constant 0 : i32
    %c0_i32_0 = arith.constant 0 : i32
    %c0_i32_1 = arith.constant 0 : i32
    %c0_i32_2 = arith.constant 0 : i32
    return %c0_i32, %c0_i32_0, %c0_i32_1 : i32, i32, i32
  }
  func.func @transform_3(%arg0: i32, %arg1: i32) -> (i32, i32, i32) {
    %c0_i32 = arith.constant 0 : i32
    %c0_i32_0 = arith.constant 0 : i32
    return %arg0, %c0_i32, %arg1 : i32, i32, i32
  }
}

</mosaic_0001>

<bundles_post_ra>
// kernel: tpu_custom_call.1
= control target key start
LH: loop header
LB: loop body
LE: loop exit
PB: predicated region body
PF: predicated region fallthrough
CT: control target
= control target key end

     0   :  { %8 = vsyncpa [#allocation3], 0  ;;  %s797_s0 = inlined_call_operand.hbm [shape: f32[2,4,256], index: 0, kind: input, shape index: {}]   ;;  %s798_s1 = inlined_call_operand.vmem [shape: f32[1,4,1], index: 1, kind: input, shape index: {}]   ;;  %s799_s2 = inlined_call_operand.vmem [shape: f32[1,4,1], index: 2, kind: input, shape index: {}]   ;;  %s800_s3 = inlined_call_operand.hbm [shape: f32[2,4,256], index: 3, kind: output, shape index: {}]  }
   0x1   :  { %10 = vsyncpa [#allocation3 + $0x1], 0 }
   0x2   :  { %11 = vsyncpa [#allocation4], 0 }
   0x3   :  { %13 = vsyncpa [#allocation4 + $0x1], 0  ;;  %s593_s12 = smov 0   ;;  %s595_s13 = smov 0  }
   0x4   :  { %s597_s14 = smov 0   ;;  %s599_s15 = smov 0  }
   0x5   :  { %s601_s16 = smov 0   ;;  %s603_s17 = smov 0  }
   0x6   :  { %s605_s18 = smov 0   ;;  %s607_s19 = smov 0  }
   0x7 LB: > { %s343_s20 = sadd.s32 4294967295, %s568_s19   ;;  %s344_s21 = sadd.s32 4294967294, %s568_s19   ;;  %s568_s19 = sphi %s607_s19, %s19_s19   ;;  %s564_s18 = sphi %s605_s18, %s817_s18   ;;  %s560_s17 = sphi %s603_s17, %s816_s17   ;;  %s556_s16 = sphi %s601_s16, %s815_s16   ;;  %s552_s15 = sphi %s599_s15, %s814_s15   ;;  %s548_s14 = sphi %s597_s14, %s813_s14   ;;  %s544_s13 = sphi %s595_s13, %s812_s13   ;;  %s540_s12 = sphi %s593_s12, %s811_s12  }
   0x8   : > { %s28_s22 = sadd.s32 1, %s560_s17  ;;  %s31_s23 = sadd.s32 1, %s564_s18 }
   0x9   : > { %p29_p0 = scmp.ge.s32.totalorder %s28_s22, 2  ;;  %s40_s24 = sadd.s32 1, %s548_s14 }
   0xa   : > { %p47_p1 = scmp.ne.s32.totalorder %s548_s14, %s544_s13  ;;  %p48_p2 = scmp.eq.s32.totalorder %s568_s19, 0 }
   0xb   : > { %s819_s22 = smov (%p29_p0, %s28_s22), 0  ;;  %s821_s23 = smov (!%p29_p0, %s31_s23), %s564_s18 }
   0xc   : > { %s36_s25 = ssub.s32 %s560_s17, %s819_s22  ;;  %p646_p3 = por %p48_p2, %p47_p1 }
   0xd   : > { %p33_p4 = scmp.ge.s32.totalorder %s821_s23, 2  ;;  %p53_p5 = scmp.ne.s32.totalorder %s544_s13, %s540_s12 }
   0xe   : > { %p54_p6 = scmp.eq.s32.totalorder %s343_s20, 0  ;;  %p121_p7 = scmp.eq.s32.totalorder %s343_s20, 3 }
   0xf   : > { %s823_s23 = smov (%p33_p4, %s821_s23), 0  ;;  %p127_p10 = scmp.eq.s32.totalorder %s344_s21, 3 }
  0x10   : > { %p654_p8 = por %p54_p6, %p53_p5  ;;  %p658_p9 = por %p121_p7, %p47_p1 }
  0x11   : > { %s35_s29 = ssub.s32 %s564_s18, %s823_s23  ;;  %p664_p12 = por %p127_p10, %p53_p5 }
  0x12   : > { %s804_s28 = scalar_select %p658_p9, 1, 0 }
  0x13   : > { %s37_s30 = sor.u32 %s36_s25, %s35_s29  ;;  %p370_p13 = scmp.lt.s32.totalorder %s568_s19, 4 }
  0x14   : > { %p38_p11 = scmp.eq.s32.totalorder %s37_s30, 0  ;;  %s153_s5 = sand.u32 1, %s548_s14  }
  0x15   : > { %s805_s4 = scalar_select %p664_p12, 1, 0 }
  0x16   : > { %s671_s6 = scalar_select %p38_p11, %s548_s14, %s40_s24  }
  0x17   : > { %s347_s7 = sshll.u32 %s153_s5, 2  ;;  %s348_s8 = sshll.u32 %s564_s18, 1 }
  0x18   : > { %s162_s9 = sadd.s32 %s560_s17, %s348_s8  ;;  %s157_s10 = scalar_lea.vmem [#allocation2], %s347_s7 }
  0x19   : > { %s166_s11 = sshll.u32 %s157_s10, 4  ;;  %s349_s20 = sshll.u32 %s162_s9, 6  ;;  %s675_s11 = int_to_ptr.vmem [resolvable:$true] %s166_s11 }
  0x1a   : > { %s680_s29 = scalar_lea.hbm %s797_s0, %s349_s20  ;;  %p684_p0 = pnand %p370_p13, %p646_p3 }
  0x1b   : > { %s154_s30 = scalar_lea.sflag [#allocation3], %s153_s5  ;;  %s440_s7 = scalar_lea.hbm %s680_s29, 64 }
  0x1c   : > { %p441_p4 = scmp.ne.s32.totalorder %s680_s29, %s440_s7  ;;  %p442_p5 = pneg %p684_p0 }
  0x1d   : > { %s445_s9 = scalar_lea.hbm %s797_s0, 256  ;;  %p446_p3 = scmp.lt.u32.totalorder %s680_s29, %s797_s0 }
  0x1e   : > { %p443_p6 = pnand %p442_p5, %p441_p4  ;;  %p447_p10 = scmp.lt.u32.totalorder %s445_s9, %s440_s7 }
  0x1f   : > { %p449_p13 = scmp.lt.u32.totalorder %s440_s7, %s680_s29 }
  0x20   : > { %p444_p7 = pneg %p443_p6  ;;  %p448_p11 = por %p447_p10, %p446_p3 }
  0x22   : > { %p450_p1 = por %p449_p13, %p448_p11 }
  0x24   : > { %p451_p2 = pnand %p450_p1, %p444_p7 }
  0x26   : > { %454 = shalt.err (!%p451_p2)
}
  0x27   : > { %s455_s5 = scalar_lea.vmem %s675_s11, 64  ;;  %s570_s21 = smov [#allocation2]  }
  0x28   : > { %p456_p4 = scmp.ne.s32.totalorder %s675_s11, %s455_s5  ;;  %s460_s25 = sshll.u32 %s570_s21, 4  ;;  %s461_s25 = int_to_ptr.vmem [resolvable:$false] %s460_s25 }
  0x29   : > { %s462_s26 = scalar_lea.vmem %s461_s25, 128  ;;  %p463_p9 = scmp.lt.s32.totalorder %s675_s11, %s461_s25 }
  0x2a   : > { %p458_p6 = pnand %p456_p4, %p442_p5  ;;  %p464_p3 = scmp.lt.s32.totalorder %s462_s26, %s455_s5 }
  0x2c   : > { %p459_p12 = pneg %p458_p6  ;;  %p465_p10 = por %p464_p3, %p463_p9 }
  0x2e   : > { %p466_p11 = pnand %p465_p10, %p459_p12 }
  0x30   : > { %469 = shalt.err (!%p466_p11)
}
  0x31   : > { %365 = dma.hbm_to_vmem [thread:$0]  (!%p684_p0), %s680_s29, 64, %s675_s11, %s154_s30  }
  0x32   : > { %p807_p1 = scmp.lt.s32.totalorder %s568_s19, 5  ;;  %p808_p2 = scmp.ge.s32.totalorder %s568_s19, 1 }
  0x34   : > { %p172_p5 = pnand %p808_p2, %p807_p1 }
  0x35   : > { %s720_s7 = sand.u32 (!%p172_p5), 1, %s544_s13  }
  0x36   : > { %175 = sbr.rel (%p172_p5) target bundleno = 212 (0xd4), region = 32  ;;  %s351_s8 = sshll.u32 (!%p172_p5), %s720_s7, 2 }
  0x37   : > { %s178_s9 = scalar_lea.sflag (!%p172_p5), [#allocation3], %s720_s7  ;;  %s181_s24 = scalar_lea.vmem (!%p172_p5), [#allocation2], %s351_s8 }
  0x3d   : > { %531 = dma.done.wait (%p654_p8), %s178_s9, 64  }
  0x3e   : > { %533 = vsyncadd (%p654_p8), %s178_s9, 4294967232  ;;  %v571_v0 = vmov 0   ;;  %v226_v1 = vld [vmem:[%s798_s1] sm:$0xf]  ;;  %vm205_vm0 = vcmask 1043456   ;;  %s354_s27 = sshll.u32 %s556_s16, 1 }
  0x3f   : > { %437 = vset.pattern.permute.xlu0 %v571_v0  ;;  %v227_v2 = vld [vmem:[%s799_s2] sm:$0xf]  ;;  %s254_s20 = sadd.s32 %s552_s15, %s354_s27  ;;  %s203_s21 = scalar_lea.vmem [#allocation5], %s351_s8 }
  0x40   : > { %231 = vperm.xlu0 %437, %v226_v1   ;;  %v204_v3 = vld [vmem:[%s181_s24] sm:$0xf]  ;;  %s355_s5 = sshll.u32 %s254_s20, 6  ;;  %s258_s25 = sshll.u32 %s203_s21, 4  ;;  %s745_s25 = int_to_ptr.vmem [resolvable:$true] %s258_s25 }
  0x41   : > { %v206_v4 = vsel %vm205_vm0, %v204_v3, 0.0  ;;  %s743_s24 = scalar_lea.hbm %s800_s3, %s355_s5  ;;  %s243_s15 = scalar_lea.sflag [#allocation4], %s720_s7 }
  0x42   : > { %v207_v5 = vrot.slane %v206_v4, 4  ;;  %s470_s16 = scalar_lea.vmem %s745_s25, 64  ;;  %p809_p9 = scmp.ne.s32.totalorder %s804_s28, 0 }
  0x43   : > { %p471_p8 = scmp.ne.s32.totalorder %s745_s25, %s470_s16  ;;  %s572_s8 = smov [#allocation5]  }
  0x44   : > { %237 = vperm.xlu0 %437, %v227_v2   ;;  %v208_v6 = vadd.f32 %v207_v5, %v206_v4  ;;  %s474_s11 = sshll.u32 %s572_s8, 4  ;;  %s475_s11 = int_to_ptr.vmem [resolvable:$false] %s474_s11 }
  0x45   : > { %p472_p12 = pnand %p471_p8, %p809_p9  ;;  %s476_s29 = scalar_lea.vmem %s475_s11, 128 }
  0x46   : > { %v209_v7 = vrot.slane %v208_v6, 2  ;;  %p477_p7 = scmp.lt.s32.totalorder %s745_s25, %s475_s11  ;;  %p478_p13 = scmp.lt.s32.totalorder %s476_s29, %s470_s16 }
  0x47   : > { %p473_p0 = pneg %p472_p12 }
  0x48   : > { %v210_v8 = vadd.f32 %v209_v7, %v208_v6  ;;  %p479_p4 = por %p478_p13, %p477_p7 }
  0x4a   : > { %v211_v9 = vrot.slane %v210_v8, 1  ;;  %p480_p6 = pnand %p479_p4, %p473_p0 }
  0x4c   : > { %v212_v10 = vadd.f32 %v211_v9, %v210_v8 }
  0x4e   : > { %v213_v11 = vmul.f32 0.25, %v212_v10 }
  0x50   : > { %v214_v12 = vsub.f32 %v204_v3, %v213_v11 }
  0x52   : > { %v215_v13 = vmul.f32 %v214_v12, %v214_v12 }
  0x54   : > { %v216_v14 = vsel %vm205_vm0, %v215_v13, 0.0 }
  0x55   : > { %v217_v15 = vrot.slane %v216_v14, 4 }
  0x57   : > { %v218_v16 = vadd.f32 %v217_v15, %v216_v14 }
  0x59   : > { %v219_v17 = vrot.slane %v218_v16, 2 }
  0x5b   : > { %v220_v18 = vadd.f32 %v219_v17, %v218_v16 }
  0x5d   : > { %v221_v19 = vrot.slane %v220_v18, 1 }
  0x5f   : > { %v222_v20 = vadd.f32 %v221_v19, %v220_v18 }
  0x61   : > { %v223_v21 = vmul.f32 0.25, %v222_v20 }
  0x63   : > { %v224_v22 = vadd.f32 1e-06, %v223_v21 }
  0x65   : > { %438 = vrsqrt.f32 %v224_v22 }
  0x6f   : > { %v439_v23 = vpop.eup %438 }
  0x70   : > { %v228_v24 = vmul.f32 %v439_v23, %v214_v12 }
  0xbf   : > { %v232_v25 = vpop.permute.xlu0 %231 }
  0xc0   : > { %v234_v26 = vmul.f32 %v232_v25, %v228_v24 }
  0xc3   : > { %v238_v27 = vpop.permute.xlu0 %237 }
  0xc4   : > { %v240_v28 = vadd.f32 %v238_v27, %v234_v26 }
  0xc6   : > { %241 = vst [vmem:[%s203_s21] sm:$0xf] %v240_v28 }
  0xc7   : > { %483 = shalt.err (!%p480_p6)
}
  0xc8   : > { %s484_s7 = scalar_lea.hbm %s743_s24, 64  ;;  %s488_s27 = scalar_lea.hbm %s800_s3, 256 }
  0xc9   : > { %p485_p3 = scmp.ne.s32.totalorder %s743_s24, %s484_s7  ;;  %p489_p1 = scmp.lt.u32.totalorder %s743_s24, %s800_s3 }
  0xca   : > { %p490_p2 = scmp.lt.u32.totalorder %s488_s27, %s484_s7  ;;  %p492_p8 = scmp.lt.u32.totalorder %s484_s7, %s743_s24 }
  0xcb   : > { %p486_p10 = pnand %p485_p3, %p809_p9 }
  0xcc   : > { %p491_p5 = por %p490_p2, %p489_p1 }
  0xcd   : > { %p487_p11 = pneg %p486_p10 }
  0xce   : > { %p493_p12 = por %p492_p8, %p491_p5 }
  0xd0   : > { %p494_p0 = pnand %p493_p12, %p487_p11 }
  0xd2   : > { %497 = shalt.err (!%p494_p0)
}
  0xd3   : > { %360 = dma.vmem_to_hbm [thread:$0]  (%p809_p9), %s745_s25, 64, %s743_s24, %s243_s15  }
  0xd4 PF: > { %p371_p7 = scmp.ge.s32.totalorder %s568_s19, 2  ;;  %s270_s21 = sand.u32 1, %s540_s12  }
  0xd5   : > { %p810_p13 = scmp.ne.s32.totalorder %s805_s4, 0  ;;  %s271_s26 = scalar_lea.sflag [#allocation4], %s270_s21 }
  0xd7   : > { %p367_p4 = pnand %p371_p7, %p810_p13 }
  0xd9   : > { %535 = dma.done.wait (!%p367_p4), %s271_s26, 64  }
  0xda   : > { %537 = vsyncadd (!%p367_p4), %s271_s26, 4294967232  ;;  %s19_s19 = sadd.s32 1, %s568_s19   ;;  %s811_s12 = smov %s544_s13 }
  0xdb   : > { %p16_p6 = scmp.ge.s32.totalorder %s19_s19, 6   ;;  %s812_s13 = smov %s548_s14 }
  0xdc   : > { %s813_s14 = smov %s671_s6  ;;  %s814_s15 = smov %s560_s17 }
  0xdd   : > { %s815_s16 = smov %s564_s18  ;;  %s816_s17 = smov %s819_s22 }
  0xde   : > { %s817_s18 = smov %s823_s23  ;;  %18 = sbr.rel (!%p16_p6) target bundleno = 7 (0x7), region = 77 }
  0xe5   :  { %276 = vsyncpa [#allocation3], 1 }
  0xe6   :  { %278 = vsyncpa [#allocation3 + $0x1], 1 }
  0xe7   :  { %279 = vsyncpa [#allocation4], 1 }
  0xe8   :  { %281 = vsyncpa [#allocation4 + $0x1], 1 }

</bundles_post_ra>
